<compile_context>
chip_gen: v5e
topology: v5e:2x2
jax: 0.10.0
libtpu: 0.0.40
codegen_flags: <defaults>
</compile_context>

<pallas_src>
import functools

import jax
import jax.numpy as jnp
from jax.experimental import pallas as pl
from jax.experimental.pallas import tpu as pltpu


def _round_up(a, b):
    return (a + b - 1) // b * b


def vae_kernel(x_ref, eps_ref,
               wuv_ref, buv_ref,   # fused encoder: [C_in, 2*C_out] bf16, [1, 2*C_out] f32
               wd_ref, bd_ref,     # decoder      : [C_out, C_in]  bf16, [1, C_in]    f32
               out_ref, z_ref, mu_ref, lv_ref):
    c_out = mu_ref.shape[1]

    # In-kernel bf16 cast (VPU, hidden under the streaming DMA); input stays f32 in HBM.
    x = x_ref[...].astype(jnp.bfloat16)                               # bf16 [T, C_in]

    # --- encode (fused mu | log_var matmul, f32 accumulate on the MXU) ---
    enc = jnp.dot(x, wuv_ref[...],
                  preferred_element_type=jnp.float32) + buv_ref[...]  # f32 [T, 2*C_out]
    mu = enc[:, :c_out]
    log_var = enc[:, c_out:]

    # --- reparameterize (f32 elementwise; exp on the EUP) ---
    std = jnp.exp(0.5 * log_var)
    z = eps_ref[...].astype(jnp.float32) * std + mu                   # f32 [T, C_out]

    # --- decode (bf16 operands, f32 accumulate) ---
    out = jnp.dot(z.astype(wd_ref.dtype), wd_ref[...],
                  preferred_element_type=jnp.float32) + bd_ref[...]   # f32 [T, C_in]

    # Direct stores into four separate outputs (no concat temp, no wrapper unpack).
    out_ref[...] = out.astype(out_ref.dtype)
    z_ref[...] = z.astype(z_ref.dtype)
    mu_ref[...] = mu.astype(mu_ref.dtype)
    lv_ref[...] = log_var.astype(lv_ref.dtype)


def vae_forward(x, eps, params, *, tile_n=4096):
    """x: [B, M, C_in] f32, eps: [B, M, C_out] (any float dtype) -> (out, z, mu, log_var) f32."""
    B, M, C_in = x.shape
    C_out = params["wu"].shape[1]
    N = B * M

    # Free row-major metadata reshapes — no extra HBM pass, no dtype cast here.
    x2 = x.reshape(N, C_in)
    eps2 = eps.reshape(N, C_out)
    # TODO(synk): optionally generate eps in-kernel (pltpu.prng_seed + pltpu.stateful_normal)
    # to remove the eps HBM stream entirely; kept as a streamed input for determinism.

    # Host-side weight prep (tiny): fuse encoder weights, cast matmul operands to bf16.
    wuv = jnp.concatenate([params["wu"], params["wv"]], axis=1).astype(jnp.bfloat16)
    buv = jnp.concatenate([params["bu"], params["bv"]], axis=1).astype(jnp.float32)
    wd = params["wd"].astype(jnp.bfloat16)
    bd = params["bd"].astype(jnp.float32)

    # --- TILE_N / VMEM budget (generation-aware: conservative enough for v7x's 64 MiB) ---
    eps_isz = eps2.dtype.itemsize
    in_row = 4 * C_in + eps_isz * C_out                 # x + eps bytes per row
    out_row = 4 * C_in + 3 * 4 * C_out                  # out + z + mu + log_var bytes per row
    bytes_per_row = 2 * (in_row + out_row)              # double-buffered streams
    weight_bytes = wuv.size * 2 + wd.size * 2 + buv.size * 4 + bd.size * 4

    vmem_budget = 40 * 1024 * 1024
    cap_rows = max(16, ((vmem_budget - 2 * weight_bytes) // max(bytes_per_row, 1)) // 16 * 16)
    TILE_N = min(tile_n, _round_up(N, 16), cap_rows)
    TILE_N = max(16, (TILE_N // 16) * 16)                # bf16 sublane multiple

    grid = (pl.cdiv(N, TILE_N),)                         # ragged tail = partial last block

    need = TILE_N * bytes_per_row + 2 * weight_bytes + (4 << 20)
    vmem_limit = int(min(max(need, 32 << 20), 48 << 20))

    flops = 2 * N * C_in * (2 * C_out) + 2 * N * C_out * C_in
    bytes_accessed = (N * C_in * 4 + N * C_out * eps_isz
                      + weight_bytes
                      + N * (C_in * 4 + 3 * C_out * 4))

    out2, z2, mu2, lv2 = pl.pallas_call(
        vae_kernel,
        out_shape=(
            jax.ShapeDtypeStruct((N, C_in), jnp.float32),    # out
            jax.ShapeDtypeStruct((N, C_out), jnp.float32),   # z
            jax.ShapeDtypeStruct((N, C_out), jnp.float32),   # mu
            jax.ShapeDtypeStruct((N, C_out), jnp.float32),   # log_var
        ),
        grid=grid,
        in_specs=[
            pl.BlockSpec((TILE_N, C_in), lambda i: (i, 0)),      # x   (row-tiled, f32)
            pl.BlockSpec((TILE_N, C_out), lambda i: (i, 0)),     # eps (row-tiled)
            pl.BlockSpec((C_in, 2 * C_out), lambda i: (0, 0)),   # wuv (VMEM-resident)
            pl.BlockSpec((1, 2 * C_out), lambda i: (0, 0)),      # buv
            pl.BlockSpec((C_out, C_in), lambda i: (0, 0)),       # wd
            pl.BlockSpec((1, C_in), lambda i: (0, 0)),           # bd
        ],
        out_specs=(
            pl.BlockSpec((TILE_N, C_in), lambda i: (i, 0)),
            pl.BlockSpec((TILE_N, C_out), lambda i: (i, 0)),
            pl.BlockSpec((TILE_N, C_out), lambda i: (i, 0)),
            pl.BlockSpec((TILE_N, C_out), lambda i: (i, 0)),
        ),
        compiler_params=pltpu.CompilerParams(
            dimension_semantics=("parallel",),        # megacore sharding on v7x
            vmem_limit_bytes=vmem_limit,
        ),
        cost_estimate=pl.CostEstimate(
            flops=flops,
            transcendentals=N * C_out,
            bytes_accessed=bytes_accessed,
        ),
    )(x2, eps2, wuv, buv, wd, bd)

    # Free metadata reshapes back to [B, M, .]
    return (out2.reshape(B, M, C_in),
            z2.reshape(B, M, C_out),
            mu2.reshape(B, M, C_out),
            lv2.reshape(B, M, C_out))


def xavier_uniform(key, fan_in, fan_out):
    # matches torch.nn.init.xavier_uniform_ for a (fan_out, fan_in) weight,
    # returned already transposed to [fan_in, fan_out] for x @ W.
    bound = (6.0 / (fan_in + fan_out)) ** 0.5
    return jax.random.uniform(key, (fan_in, fan_out), jnp.float32, -bound, bound)


def init_params(key, in_ch, out_ch):
    k1, k2, k3 = jax.random.split(key, 3)
    return {
        "wu": xavier_uniform(k1, in_ch, out_ch),
        "bu": jnp.zeros((1, out_ch), jnp.float32),
        "wv": xavier_uniform(k2, in_ch, out_ch),
        "bv": jnp.zeros((1, out_ch), jnp.float32),
        "wd": xavier_uniform(k3, out_ch, in_ch),
        "bd": jnp.zeros((1, in_ch), jnp.float32),
    }


if __name__ == "__main__":
    B, M, C_in, C_out = 2, 8, 32, 16

    key = jax.random.PRNGKey(0)
    k_x, k_eps, k_p = jax.random.split(key, 3)

    x = jax.random.normal(k_x, (B, M, C_in), jnp.float32)
    # eps ~ N(0,1); generated directly in bf16 (halves its HBM stream, no cast
    # pre-pass) and fed to the kernel so the run is deterministic.
    eps = jax.random.normal(k_eps, (B, M, C_out), jnp.bfloat16)
    params = init_params(k_p, C_in, C_out)

    fwd = jax.jit(functools.partial(vae_forward, tile_n=4096))
    out, z, mu, log_var = jax.block_until_ready(fwd(x, eps, params))

    # NOTE: the reference mirrors the kernel's precision choice (bf16 matmul
    # operands / bf16 eps, f32 accumulation + f32 elementwise), so this check
    # isolates kernel correctness rather than comparing against a full-f32
    # PyTorch forward (which would differ at the ~1e-2 level anyway).
    q = lambda a: a.astype(jnp.bfloat16).astype(jnp.float32)
    hi = jax.lax.Precision.HIGHEST
    eps_f32 = eps.astype(jnp.float32)
    mu_ref = jnp.einsum("bmc,cd->bmd", q(x), q(params["wu"]), precision=hi) + params["bu"][0]
    lv_ref = jnp.einsum("bmc,cd->bmd", q(x), q(params["wv"]), precision=hi) + params["bv"][0]
    z_ref = eps_f32 * jnp.exp(0.5 * lv_ref) + mu_ref
    out_ref = jnp.einsum("bmd,dc->bmc", q(z_ref), q(params["wd"]), precision=hi) + params["bd"][0]

    assert jnp.allclose(mu, mu_ref, atol=1e-2, rtol=1e-2)
    assert jnp.allclose(log_var, lv_ref, atol=1e-2, rtol=1e-2)
    assert jnp.allclose(z, z_ref, atol=1e-2, rtol=1e-2)
    assert jnp.allclose(out, out_ref, atol=1e-2, rtol=1e-2)

    print("KERNEL_OK")
</pallas_src>

<mosaic_0001>
module attributes {stable_mosaic.version = 11 : i64} {
  func.func @vae_kernel(%arg0: i32, %arg1: memref<16x32xf32, #tpu.memory_space<vmem>>, %arg2: memref<16x16xbf16, #tpu.memory_space<vmem>>, %arg3: memref<32x32xbf16, #tpu.memory_space<vmem>>, %arg4: memref<1x32xf32, #tpu.memory_space<vmem>>, %arg5: memref<16x32xbf16, #tpu.memory_space<vmem>>, %arg6: memref<1x32xf32, #tpu.memory_space<vmem>>, %arg7: memref<16x32xf32, #tpu.memory_space<vmem>>, %arg8: memref<16x16xf32, #tpu.memory_space<vmem>>, %arg9: memref<16x16xf32, #tpu.memory_space<vmem>>, %arg10: memref<16x16xf32, #tpu.memory_space<vmem>>) attributes {dimension_semantics = [#tpu.dimension_semantics<parallel>], iteration_bounds = array<i64: 1>, scalar_prefetch = 0 : i64, scratch_operands = 0 : i64, tpu.core_type = #tpu.core_type<tc>, window_params = [{transform_indices = @transform_0, window_bounds = array<i64: 16, 32>}, {transform_indices = @transform_1, window_bounds = array<i64: 16, 16>}, {pipeline_mode = #tpu.pipeline_mode<synchronous>, transform_indices = @transform_2, window_bounds = array<i64: 32, 32>}, {pipeline_mode = #tpu.pipeline_mode<synchronous>, transform_indices = @transform_3, window_bounds = array<i64: 1, 32>}, {pipeline_mode = #tpu.pipeline_mode<synchronous>, transform_indices = @transform_4, window_bounds = array<i64: 16, 32>}, {pipeline_mode = #tpu.pipeline_mode<synchronous>, transform_indices = @transform_5, window_bounds = array<i64: 1, 32>}, {transform_indices = @transform_6, window_bounds = array<i64: 16, 32>}, {transform_indices = @transform_7, window_bounds = array<i64: 16, 16>}, {transform_indices = @transform_8, window_bounds = array<i64: 16, 16>}, {transform_indices = @transform_9, window_bounds = array<i64: 16, 16>}]} {
    %c0 = arith.constant 0 : index
    %c0_0 = arith.constant 0 : index
    %0 = vector.load %arg1[%c0, %c0_0] : memref<16x32xf32, #tpu.memory_space<vmem>>, vector<16x32xf32>
    %1 = arith.truncf %0 : vector<16x32xf32> to vector<16x32xbf16>
    %c0_1 = arith.constant 0 : index
    %c0_2 = arith.constant 0 : index
    %2 = vector.load %arg3[%c0_1, %c0_2] : memref<32x32xbf16, #tpu.memory_space<vmem>>, vector<32x32xbf16>
    %cst = arith.constant dense<0.000000e+00> : vector<16x32xf32>
    %3 = tpu.matmul %1, %2, %cst {dimension_numbers = #tpu.dot_dimension_numbers<[1], [0], [0], [1], [0, 0, 1, 1], [], []>} : vector<16x32xbf16>, vector<32x32xbf16>, vector<16x32xf32> -> vector<16x32xf32>
    %c0_3 = arith.constant 0 : index
    %c0_4 = arith.constant 0 : index
    %4 = vector.load %arg4[%c0_3, %c0_4] : memref<1x32xf32, #tpu.memory_space<vmem>>, vector<1x32xf32>
    %5 = vector.broadcast %4 : vector<1x32xf32> to vector<16x32xf32>
    %6 = arith.addf %3, %5 : vector<16x32xf32>
    %7 = vector.extract_strided_slice %6 {offsets = [0, 0], sizes = [16, 16], strides = [1, 1]} : vector<16x32xf32> to vector<16x16xf32>
    %8 = vector.extract_strided_slice %6 {offsets = [0, 16], sizes = [16, 16], strides = [1, 1]} : vector<16x32xf32> to vector<16x16xf32>
    %cst_5 = arith.constant 5.000000e-01 : f32
    %9 = vector.broadcast %cst_5 : f32 to vector<16x16xf32>
    %10 = arith.mulf %9, %8 : vector<16x16xf32>
    %11 = math.exp %10 : vector<16x16xf32>
    %c0_6 = arith.constant 0 : index
    %c0_7 = arith.constant 0 : index
    %12 = vector.load %arg2[%c0_6, %c0_7] : memref<16x16xbf16, #tpu.memory_space<vmem>>, vector<16x16xbf16>
    %13 = arith.extf %12 : vector<16x16xbf16> to vector<16x16xf32>
    %14 = arith.mulf %13, %11 : vector<16x16xf32>
    %15 = arith.addf %14, %7 : vector<16x16xf32>
    %16 = arith.truncf %15 : vector<16x16xf32> to vector<16x16xbf16>
    %c0_8 = arith.constant 0 : index
    %c0_9 = arith.constant 0 : index
    %17 = vector.load %arg5[%c0_8, %c0_9] : memref<16x32xbf16, #tpu.memory_space<vmem>>, vector<16x32xbf16>
    %cst_10 = arith.constant dense<0.000000e+00> : vector<16x32xf32>
    %18 = tpu.matmul %16, %17, %cst_10 {dimension_numbers = #tpu.dot_dimension_numbers<[1], [0], [0], [1], [0, 0, 1, 1], [], []>} : vector<16x16xbf16>, vector<16x32xbf16>, vector<16x32xf32> -> vector<16x32xf32>
    %c0_11 = arith.constant 0 : index
    %c0_12 = arith.constant 0 : index
    %19 = vector.load %arg6[%c0_11, %c0_12] : memref<1x32xf32, #tpu.memory_space<vmem>>, vector<1x32xf32>
    %20 = vector.broadcast %19 : vector<1x32xf32> to vector<16x32xf32>
    %21 = arith.addf %18, %20 : vector<16x32xf32>
    %c0_13 = arith.constant 0 : index
    %c0_14 = arith.constant 0 : index
    %22 = vector.load %arg7[%c0_13, %c0_14] : memref<16x32xf32, #tpu.memory_space<vmem>>, vector<16x32xf32>
    tpu.vector_store %arg7[%c0_13, %c0_14], %21 {strides = array<i32>} : memref<16x32xf32, #tpu.memory_space<vmem>>, vector<16x32xf32>,
    %c0_15 = arith.constant 0 : index
    %c0_16 = arith.constant 0 : index
    %23 = vector.load %arg8[%c0_15, %c0_16] : memref<16x16xf32, #tpu.memory_space<vmem>>, vector<16x16xf32>
    tpu.vector_store %arg8[%c0_15, %c0_16], %15 {strides = array<i32>} : memref<16x16xf32, #tpu.memory_space<vmem>>, vector<16x16xf32>,
    %c0_17 = arith.constant 0 : index
    %c0_18 = arith.constant 0 : index
    %24 = vector.load %arg9[%c0_17, %c0_18] : memref<16x16xf32, #tpu.memory_space<vmem>>, vector<16x16xf32>
    tpu.vector_store %arg9[%c0_17, %c0_18], %7 {strides = array<i32>} : memref<16x16xf32, #tpu.memory_space<vmem>>, vector<16x16xf32>,
    %c0_19 = arith.constant 0 : index
    %c0_20 = arith.constant 0 : index
    %25 = vector.load %arg10[%c0_19, %c0_20] : memref<16x16xf32, #tpu.memory_space<vmem>>, vector<16x16xf32>
    tpu.vector_store %arg10[%c0_19, %c0_20], %8 {strides = array<i32>} : memref<16x16xf32, #tpu.memory_space<vmem>>, vector<16x16xf32>,
    return
  }
  func.func @transform_0(%arg0: i32) -> (i32, i32) {
    %c0_i32 = arith.constant 0 : i32
    %c0_i32_0 = arith.constant 0 : i32
    return %arg0, %c0_i32 : i32, i32
  }
  func.func @transform_1(%arg0: i32) -> (i32, i32) {
    %c0_i32 = arith.constant 0 : i32
    %c0_i32_0 = arith.constant 0 : i32
    return %arg0, %c0_i32 : i32, i32
  }
  func.func @transform_2(%arg0: i32) -> (i32, i32) {
    %c0_i32 = arith.constant 0 : i32
    %c0_i32_0 = arith.constant 0 : i32
    %c0_i32_1 = arith.constant 0 : i32
    return %c0_i32, %c0_i32_0 : i32, i32
  }
  func.func @transform_3(%arg0: i32) -> (i32, i32) {
    %c0_i32 = arith.constant 0 : i32
    %c0_i32_0 = arith.constant 0 : i32
    %c0_i32_1 = arith.constant 0 : i32
    return %c0_i32, %c0_i32_0 : i32, i32
  }
  func.func @transform_4(%arg0: i32) -> (i32, i32) {
    %c0_i32 = arith.constant 0 : i32
    %c0_i32_0 = arith.constant 0 : i32
    %c0_i32_1 = arith.constant 0 : i32
    return %c0_i32, %c0_i32_0 : i32, i32
  }
  func.func @transform_5(%arg0: i32) -> (i32, i32) {
    %c0_i32 = arith.constant 0 : i32
    %c0_i32_0 = arith.constant 0 : i32
    %c0_i32_1 = arith.constant 0 : i32
    return %c0_i32, %c0_i32_0 : i32, i32
  }
  func.func @transform_6(%arg0: i32) -> (i32, i32) {
    %c0_i32 = arith.constant 0 : i32
    %c0_i32_0 = arith.constant 0 : i32
    return %arg0, %c0_i32 : i32, i32
  }
  func.func @transform_7(%arg0: i32) -> (i32, i32) {
    %c0_i32 = arith.constant 0 : i32
    %c0_i32_0 = arith.constant 0 : i32
    return %arg0, %c0_i32 : i32, i32
  }
  func.func @transform_8(%arg0: i32) -> (i32, i32) {
    %c0_i32 = arith.constant 0 : i32
    %c0_i32_0 = arith.constant 0 : i32
    return %arg0, %c0_i32 : i32, i32
  }
  func.func @transform_9(%arg0: i32) -> (i32, i32) {
    %c0_i32 = arith.constant 0 : i32
    %c0_i32_0 = arith.constant 0 : i32
    return %arg0, %c0_i32 : i32, i32
  }
}

</mosaic_0001>

<bundles_post_ra>
// kernel: vae_forward.1
= control target key start
LH: loop header
LB: loop body
LE: loop exit
PB: predicated region body
PF: predicated region fallthrough
CT: control target
= control target key end

     0   :  { %15 = vsyncpa [#allocation3], 0  ;;  %s463_s0 = inlined_call_operand.vmem [shape: f32[16,32], index: 0, kind: input, shape index: {}]   ;;  %s464_s1 = inlined_call_operand.vmem [shape: bf16[16,16], index: 1, kind: input, shape index: {}]   ;;  %s465_s2 = inlined_call_operand.vmem [shape: bf16[32,32], index: 2, kind: input, shape index: {}]   ;;  %s466_s3 = inlined_call_operand.vmem [shape: f32[1,32], index: 3, kind: input, shape index: {}]   ;;  %s467_s4 = inlined_call_operand.vmem [shape: bf16[16,32], index: 4, kind: input, shape index: {}]   ;;  %s468_s5 = inlined_call_operand.vmem [shape: f32[1,32], index: 5, kind: input, shape index: {}]   ;;  %s469_s6 = inlined_call_operand.hbm [shape: f32[16,32], index: 6, kind: output, shape index: {0}]   ;;  %s470_s7 = inlined_call_operand.hbm [shape: f32[16,16], index: 7, kind: output, shape index: {1}]   ;;  %s471_s8 = inlined_call_operand.hbm [shape: f32[16,16], index: 8, kind: output, shape index: {2}]   ;;  %s472_s9 = inlined_call_operand.hbm [shape: f32[16,16], index: 9, kind: output, shape index: {3}]  }
   0x1   :  { %16 = vsyncpa [#allocation5], 0  ;;  %v227_v0 = vld [vmem:[%s465_s2 + $0x8] sm:$0xff]  ;;  %v226_v1 = vld [vmem:[%s465_s2] sm:$0xff] }
   0x2   :  { %v31_v2 = vld [vmem:[%s463_s0] sm:$0xff]  ;;  %64 = vmatpush.bf16.msra.mxu0 %v227_v0  ;;  %v32_v3 = vld [vmem:[%s463_s0 + $0x8] sm:$0xff] }
   0x3   :  { %17 = vsyncpa [#allocation8], 0  ;;  %v33_v4 = vpack.c.bf16 %v32_v3, %v31_v2  ;;  %vm54_vm0 = vcmask 261120   ;;  %v240_v5 = vld [vmem:[%s466_s3] ss:$0 sm:$0xff]  ;;  %vm107_vm1 = vcmask 130048  }
   0x4   :  { %s348_s2 = smov 112   ;;  %v228_v16 = vld [vmem:[%s467_s4] sm:$0xff]  ;;  %s349_s4 = smov [#allocation4]  }
   0x5   :  { %118 = vmatpush.bf16.msra.mxu1 %v228_v16  ;;  %v230_v18 = vld [vmem:[%s464_s1] sm:$0xff]   ;;  %s158_s1 = sshll.u32 %s349_s4, 4  ;;  %s160_s23 = sshll.u32 %s470_s7, 4  ;;  %s159_s1 = int_to_ptr.vmem [resolvable:$true] %s158_s1  ;;  %s161_s23 = int_to_ptr.hbm [resolvable:$true] %s160_s23 }
   0x6   :  { %65 = vmatpush.bf16.msra.mxu0 %v226_v1  ;;  %v231_v20 = vunpack.c.l.bf16 %v230_v18  ;;  %v232_v24 = vunpack.c.h.bf16 %v230_v18  ;;  %s350_s24 = smov 128   ;;  %s351_s25 = smov 8   ;;  %v241_v29 = vld [vmem:[%s468_s5] ss:$0 sm:$0xff] }
   0x7   :  { %s352_s26 = smov [#allocation6]   ;;  %s173_s30 = sshll.u32 %s471_s8, 4  ;;  %s174_s30 = int_to_ptr.hbm [resolvable:$true] %s173_s30 }
   0x8   :  { %s171_s27 = sshll.u32 %s352_s26, 4  ;;  %s186_s11 = sshll.u32 %s472_s9, 4  ;;  %s172_s27 = int_to_ptr.vmem [resolvable:$true] %s171_s27  ;;  %s187_s11 = int_to_ptr.hbm [resolvable:$true] %s186_s11 }
   0x9   :  { %220 = vmatmul.msk.bf16.vlgmr.msra.gmra.mxu0 %vm54_vm0, %v33_v4  ;;  %s353_s12 = smov [#allocation7]   ;;  %s354_s15 = smov [#allocation2]  }
   0xa   :  { %s184_s13 = sshll.u32 %s353_s12, 4  ;;  %s145_s16 = sshll.u32 %s354_s15, 4  ;;  %s185_s13 = int_to_ptr.vmem [resolvable:$true] %s184_s13  ;;  %s146_s16 = int_to_ptr.vmem [resolvable:$true] %s145_s16 }
   0xb   :  { %s147_s18 = sshll.u32 %s469_s6, 4  ;;  %s148_s18 = int_to_ptr.hbm [resolvable:$true] %s147_s18 }
  0x86   :  { %v67_v6 = vpop.f32.mrf.mxu0 }
  0x87   :  { %v68_v7 = vadd.f32 %v240_v5, %v67_v6 }
  0x89   :  { %129 = vst.msk [vmem:[#allocation6] sm:$0xff] %vm107_vm1, %v68_v7  ;;  %133 = vrot.lane.b32.xlu1 %v68_v7, %s348_s2  ;;  %v72_v8 = vmul.f32 0.5, %v68_v7 }
  0x8b   :  { %v74_v9 = vmul.f32 1.442695, %v72_v8 }
  0x8d   :  { %242 = vpow2.f32 %v74_v9 }
  0x8e   :  { %v69_v10 = vpop.f32.mrf.mxu0 }
  0x8f   :  { %v70_v11 = vadd.f32 %v240_v5, %v69_v10 }
  0x91   :  { %v73_v12 = vmul.f32 0.5, %v70_v11  ;;  %130 = vst.msk [vmem:[#allocation6 + $0x8] sm:$0xff] %vm107_vm1, %v70_v11  ;;  %135 = vrot.lane.b32.xlu1 %v70_v11, %s348_s2 }
  0x93   :  { %v243_v13 = vpop.eup %242  ;;  %v76_v14 = vmul.f32 1.442695, %v73_v12 }
  0x94   :  { %84 = vrot.lane.b32.xlu0 %v243_v13, %s348_s2 }
  0x95   :  { %244 = vpow2.f32 %v76_v14 }
  0x9b   :  { %v245_v15 = vpop.eup %244 }
  0x9c   :  { %86 = vrot.lane.b32.xlu0 %v245_v15, %s348_s2 }
  0xfb   :  { %v134_v17 = vpop.permute.xlu1 %133 }
  0xfc   :  { %139 = vst.msk [vmem:[#allocation7] sm:$0xff] %vm107_vm1, %v134_v17 }
 0x103   :  { %v136_v19 = vpop.permute.xlu1 %135 }
 0x104   :  { %140 = vst.msk [vmem:[#allocation7 + $0x8] sm:$0xff] %vm107_vm1, %v136_v19 }
 0x105   :  { %192 = dma.vmem_to_hbm [thread:$0]  %s185_s13, 256, %s187_s11, [#allocation8], %s350_s24, %s350_s24, %s351_s25  }
 0x106   :  { %v85_v21 = vpop.permute.xlu0 %84 }
 0x107   :  { %v90_v22 = vmul.f32 %v231_v20, %v85_v21 }
 0x109   :  { %v92_v23 = vadd.f32 %v90_v22, %v68_v7 }
 0x10b   :  { %127 = vst.msk [vmem:[#allocation4] sm:$0xff] %vm107_vm1, %v92_v23 }
 0x10e   :  { %v87_v25 = vpop.permute.xlu0 %86 }
 0x10f   :  { %v91_v26 = vmul.f32 %v232_v24, %v87_v25 }
 0x111   :  { %v93_v27 = vadd.f32 %v91_v26, %v70_v11 }
 0x113   :  { %128 = vst.msk [vmem:[#allocation4 + $0x8] sm:$0xff] %vm107_vm1, %v93_v27  ;;  %v94_v28 = vpack.c.bf16 %v93_v27, %v92_v23 }
 0x114   :  { %166 = dma.vmem_to_hbm [thread:$0]  %s159_s1, 256, %s161_s23, [#allocation5], %s350_s24, %s350_s24, %s351_s25  }
 0x115   :  { %225 = vmatmul.msk.bf16.vlgmr.msra.gmra.mxu1 %vm107_vm1, %v94_v28  ;;  %179 = dma.vmem_to_hbm [thread:$0]  %s172_s27, 256, %s174_s30, [#allocation5], %s350_s24, %s350_s24, %s351_s25  }
 0x192   :  { %v120_v30 = vpop.f32.mrf.mxu1 }
 0x193   :  { %v121_v31 = vadd.f32 %v241_v29, %v120_v30 }
 0x195   :  { %125 = vst.msk [vmem:[#allocation2] sm:$0xff] %vm54_vm0, %v121_v31 }
 0x19a   :  { %v122_v32 = vpop.f32.mrf.mxu1 }
 0x19b   :  { %v123_v33 = vadd.f32 %v241_v29, %v122_v32 }
 0x19d   :  { %126 = vst.msk [vmem:[#allocation2 + $0x8] sm:$0xff] %vm54_vm0, %v123_v33 }
 0x19e   :  { %153 = dma.vmem_to_hbm [thread:$0]  %s146_s16, 256, %s148_s18, [#allocation3], %s350_s24, %s350_s24, %s351_s25  }
 0x19f   :  { %342 = dma.done.wait [#allocation3], 256  }
 0x1a0   :  { %343 = vsyncadd [#allocation3], 4294967040 }
 0x1a1   :  { %344 = dma.done.wait [#allocation5], 512  }
 0x1a2   :  { %345 = vsyncadd [#allocation5], 4294966784 }
 0x1a3   :  { %346 = dma.done.wait [#allocation8], 256  }
 0x1a4   :  { %347 = vsyncadd [#allocation8], 4294967040 }
 0x1a5   :  { %209 = vsyncpa [#allocation3], 1 }
 0x1a6   :  { %210 = vsyncpa [#allocation5], 1 }
 0x1a7   :  { %211 = vsyncpa [#allocation8], 1 }

</bundles_post_ra>
